<compile_context>
chip_gen: v5e
topology: v5e:2x2
jax: 0.10.0
libtpu: 0.0.40
codegen_flags: <defaults>
</compile_context>

<pallas_src>
import functools
import math

import jax
import jax.numpy as jnp
from jax.experimental import pallas as pl
from jax.experimental.pallas import tpu as pltpu

LANE = 128          # lane (last-dim) padding for unmasked, lane-dense stores
SUBLANE_BF16 = 16   # sublane padding so bf16 matmul operands pack cleanly


def _round_up(x, m):
    return ((x + m - 1) // m) * m


# ----------------------------- Pallas kernel -------------------------------

def _gcn_fused_kernel(a_ref, x_ref, w_ref, b_ref, h_ref):
    """Fused 5-layer GraphConv forward (A_hat @ (H @ W) + b, ReLU each layer).

    a_ref : (Np, Np)    bf16 normalized adjacency D^-1/2 A D^-1/2 (zero-padded)
    x_ref : (Np, Fp)    f32 input node features (zero-padded)
    w_ref : (L, Fp, Fp) bf16 stacked, zero-padded layer weights
    b_ref : (L, 1, Fp)  f32 stacked, zero-padded layer biases
    h_ref : (Np, Fp)    f32 final activations (ReLU of last layer)
    """
    num_layers = w_ref.shape[0]
    h = x_ref[...].astype(jnp.float32)
    for i in range(num_layers):  # static unroll over the 5 layers
        # bf16 MXU operands, f32 accumulation; A_hat re-read from VMEM per layer.
        hw = jnp.dot(h.astype(jnp.bfloat16), w_ref[i],
                     preferred_element_type=jnp.float32)
        ah = jnp.dot(a_ref[...], hw.astype(jnp.bfloat16),
                     preferred_element_type=jnp.float32)
        h = jnp.maximum(ah + b_ref[i], 0.0)  # f32 epilogue
    h_ref[...] = h.astype(h_ref.dtype)


# ------------------------- cached buffer preparation ------------------------

def prepare_gcn_buffers(a_hat, params, in_feats):
    """Pad/stack graph + parameters ONCE (cache and reuse across forward calls).

    Returns (a_p[bf16 (Np,Np)], w_p[bf16 (L,Fp,Fp)], b_p[f32 (L,1,Fp)]).
    """
    n = a_hat.shape[0]
    feat_dims = [in_feats] + [w.shape[1] for w, _ in params]
    f_pad = _round_up(max(feat_dims), LANE)
    n_pad = _round_up(n, SUBLANE_BF16)

    a_p = jnp.pad(a_hat.astype(jnp.float32),
                  ((0, n_pad - n), (0, n_pad - n))).astype(jnp.bfloat16)
    w_p = jnp.stack([
        jnp.pad(w.astype(jnp.float32),
                ((0, f_pad - w.shape[0]), (0, f_pad - w.shape[1])))
        for w, _ in params
    ]).astype(jnp.bfloat16)
    b_p = jnp.stack([
        jnp.pad(b.astype(jnp.float32).reshape(1, -1),
                ((0, 0), (0, f_pad - b.shape[0])))
        for _, b in params
    ])
    return a_p, w_p, b_p


# ------------------------------ JAX wrapper --------------------------------

def gcn_forward_fused(a_p, w_p, b_p, in_feat, h_feats):
    """GCN.forward: 5 x (GraphConv + ReLU), then thresholded clone.

    Expects pre-padded/cached (a_p, w_p, b_p) from prepare_gcn_buffers().
    """
    n, in_feats = in_feat.shape
    n_pad = a_p.shape[0]
    f_pad = w_p.shape[-1]
    num_layers = w_p.shape[0]

    # Only the (small, per-call) feature matrix needs padding here.
    x_p = jnp.pad(in_feat.astype(jnp.float32),
                  ((0, n_pad - n), (0, f_pad - in_feats)))

    flops = num_layers * (2 * n_pad * f_pad * f_pad + 2 * n_pad * n_pad * f_pad)
    in_bytes = a_p.size * 2 + x_p.size * 4 + w_p.size * 2 + b_p.size * 4
    out_bytes = n_pad * f_pad * 4
    cost = pl.CostEstimate(flops=flops, transcendentals=0,
                           bytes_accessed=in_bytes + out_bytes)
    # Explicit VMEM budget: actual buffers + generous headroom, capped well under
    # the smallest physical VMEM (v7x: 64 MiB per TensorCore).
    vmem_limit = int(min(max(2 * (in_bytes + out_bytes) + (1 << 20), 4 << 20),
                         64 << 20))

    vmem = pltpu.MemorySpace.VMEM
    h_p = pl.pallas_call(
        _gcn_fused_kernel,
        out_shape=jax.ShapeDtypeStruct((n_pad, f_pad), jnp.float32),
        in_specs=[pl.BlockSpec(memory_space=vmem)] * 4,
        out_specs=pl.BlockSpec(memory_space=vmem),
        compiler_params=pltpu.CompilerParams(vmem_limit_bytes=vmem_limit),
        cost_estimate=cost,
    )(a_p, x_p, w_p, b_p)

    h = h_p[:n, :h_feats]
    # Thresholded clone on the real (N, h_feats) block only (cheap XLA op).
    h_clone = jnp.where(h >= 0.5, 1.0, 0.0).astype(h.dtype)
    return h, h_clone


def gcn_forward(a_hat, in_feat, params):
    """Convenience path (un-cached): pad everything, then run the fused kernel."""
    h_feats = params[-1][0].shape[1]
    a_p, w_p, b_p = prepare_gcn_buffers(a_hat, params, in_feat.shape[1])
    return gcn_forward_fused(a_p, w_p, b_p, in_feat, h_feats)


# ------------------------- deterministic param init ------------------------

def xavier_uniform(key, fan_in, fan_out):
    limit = math.sqrt(6.0 / (fan_in + fan_out))
    return jax.random.uniform(
        key, (fan_in, fan_out), dtype=jnp.float32, minval=-limit, maxval=limit
    )


def init_gcn_params(key, in_feats, h_feats):
    hidden_feats = math.floor((h_feats + in_feats) / 2)
    dims = [in_feats, hidden_feats, hidden_feats, hidden_feats, hidden_feats, h_feats]
    params = []
    keys = jax.random.split(key, len(dims) - 1)
    for k, (fi, fo) in zip(keys, zip(dims[:-1], dims[1:])):
        w = xavier_uniform(k, fi, fo)
        b = jnp.zeros((fo,), dtype=jnp.float32)  # DGL GraphConv bias init = zeros
        params.append((w, b))
    return params


def make_normalized_adjacency(key, n):
    """Random symmetric graph with self-loops, A_hat = D^-1/2 A D^-1/2."""
    a = jax.random.bernoulli(key, p=0.3, shape=(n, n)).astype(jnp.float32)
    a = jnp.maximum(a, a.T)                            # symmetrize
    a = jnp.maximum(a, jnp.eye(n, dtype=jnp.float32))  # self-loops (no zero-degree)
    deg = jnp.sum(a, axis=1)
    d_inv_sqrt = 1.0 / jnp.sqrt(deg)
    return d_inv_sqrt[:, None] * a * d_inv_sqrt[None, :]


# ---------------------------------- main -----------------------------------

if __name__ == "__main__":
    key = jax.random.PRNGKey(0)
    k_graph, k_feat, k_params = jax.random.split(key, 3)

    N = 32         # number of graph nodes
    IN_FEATS = 16
    H_FEATS = 32   # hidden_feats = floor((32 + 16) / 2) = 24

    a_hat = make_normalized_adjacency(k_graph, N)
    in_feat = jax.random.normal(k_feat, (N, IN_FEATS), dtype=jnp.float32)
    params = init_gcn_params(k_params, IN_FEATS, H_FEATS)

    # Pad/stack graph + params once; reuse the cached buffers for every call.
    a_p, w_p, b_p = prepare_gcn_buffers(a_hat, params, IN_FEATS)
    a_p, w_p, b_p = jax.block_until_ready((a_p, w_p, b_p))

    fwd = jax.jit(functools.partial(gcn_forward_fused, h_feats=H_FEATS))
    h, h_clone = fwd(a_p, w_p, b_p, in_feat)
    jax.block_until_ready((h, h_clone))

    assert h.shape == (N, H_FEATS) and h_clone.shape == (N, H_FEATS)
    assert bool(jnp.all(h >= 0.0))                                    # ReLU output
    assert bool(jnp.all((h_clone == 0.0) | (h_clone == 1.0)))         # thresholded
    assert bool(jnp.all((h_clone == 1.0) == (h >= 0.5)))              # consistency
    print("KERNEL_OK")
</pallas_src>

<mosaic_0001>
module attributes {stable_mosaic.version = 11 : i64} {
  func.func @_gcn_fused_kernel(%arg0: memref<32x32xbf16, #tpu.memory_space<vmem>>, %arg1: memref<32x128xf32, #tpu.memory_space<vmem>>, %arg2: memref<5x128x128xbf16, #tpu.memory_space<vmem>>, %arg3: memref<5x1x128xf32, #tpu.memory_space<vmem>>, %arg4: memref<32x128xf32, #tpu.memory_space<vmem>>) attributes {dimension_semantics = [], scalar_prefetch = 0 : i64, scratch_operands = 0 : i64, tpu.core_type = #tpu.core_type<tc>} {
    %c0 = arith.constant 0 : index
    %c0_0 = arith.constant 0 : index
    %0 = vector.load %arg1[%c0, %c0_0] : memref<32x128xf32, #tpu.memory_space<vmem>>, vector<32x128xf32>
    %1 = arith.truncf %0 : vector<32x128xf32> to vector<32x128xbf16>
    %c0_1 = arith.constant 0 : index
    %c0_2 = arith.constant 0 : index
    %c0_3 = arith.constant 0 : index
    %2 = vector.load %arg2[%c0_1, %c0_2, %c0_3] : memref<5x128x128xbf16, #tpu.memory_space<vmem>>, vector<1x128x128xbf16>
    %3 = vector.shape_cast %2 : vector<1x128x128xbf16> to vector<128x128xbf16>
    %cst = arith.constant dense<0.000000e+00> : vector<32x128xf32>
    %4 = tpu.matmul %1, %3, %cst {dimension_numbers = #tpu.dot_dimension_numbers<[1], [0], [0], [1], [0, 0, 1, 1], [], []>} : vector<32x128xbf16>, vector<128x128xbf16>, vector<32x128xf32> -> vector<32x128xf32>
    %c0_4 = arith.constant 0 : index
    %c0_5 = arith.constant 0 : index
    %5 = vector.load %arg0[%c0_4, %c0_5] : memref<32x32xbf16, #tpu.memory_space<vmem>>, vector<32x32xbf16>
    %6 = arith.truncf %4 : vector<32x128xf32> to vector<32x128xbf16>
    %cst_6 = arith.constant dense<0.000000e+00> : vector<32x128xf32>
    %7 = tpu.matmul %5, %6, %cst_6 {dimension_numbers = #tpu.dot_dimension_numbers<[1], [0], [0], [1], [0, 0, 1, 1], [], []>} : vector<32x32xbf16>, vector<32x128xbf16>, vector<32x128xf32> -> vector<32x128xf32>
    %c0_7 = arith.constant 0 : index
    %c0_8 = arith.constant 0 : index
    %c0_9 = arith.constant 0 : index
    %8 = vector.load %arg3[%c0_7, %c0_8, %c0_9] : memref<5x1x128xf32, #tpu.memory_space<vmem>>, vector<1x1x128xf32>
    %9 = vector.shape_cast %8 : vector<1x1x128xf32> to vector<1x128xf32>
    %10 = vector.broadcast %9 : vector<1x128xf32> to vector<32x128xf32>
    %11 = arith.addf %7, %10 : vector<32x128xf32>
    %cst_10 = arith.constant 0.000000e+00 : f32
    %12 = vector.broadcast %cst_10 : f32 to vector<32x128xf32>
    %13 = arith.maximumf %11, %12 : vector<32x128xf32>
    %14 = arith.truncf %13 : vector<32x128xf32> to vector<32x128xbf16>
    %c1 = arith.constant 1 : index
    %c0_11 = arith.constant 0 : index
    %c0_12 = arith.constant 0 : index
    %15 = vector.load %arg2[%c1, %c0_11, %c0_12] : memref<5x128x128xbf16, #tpu.memory_space<vmem>>, vector<1x128x128xbf16>
    %16 = vector.shape_cast %15 : vector<1x128x128xbf16> to vector<128x128xbf16>
    %cst_13 = arith.constant dense<0.000000e+00> : vector<32x128xf32>
    %17 = tpu.matmul %14, %16, %cst_13 {dimension_numbers = #tpu.dot_dimension_numbers<[1], [0], [0], [1], [0, 0, 1, 1], [], []>} : vector<32x128xbf16>, vector<128x128xbf16>, vector<32x128xf32> -> vector<32x128xf32>
    %c0_14 = arith.constant 0 : index
    %c0_15 = arith.constant 0 : index
    %18 = vector.load %arg0[%c0_14, %c0_15] : memref<32x32xbf16, #tpu.memory_space<vmem>>, vector<32x32xbf16>
    %19 = arith.truncf %17 : vector<32x128xf32> to vector<32x128xbf16>
    %cst_16 = arith.constant dense<0.000000e+00> : vector<32x128xf32>
    %20 = tpu.matmul %18, %19, %cst_16 {dimension_numbers = #tpu.dot_dimension_numbers<[1], [0], [0], [1], [0, 0, 1, 1], [], []>} : vector<32x32xbf16>, vector<32x128xbf16>, vector<32x128xf32> -> vector<32x128xf32>
    %c1_17 = arith.constant 1 : index
    %c0_18 = arith.constant 0 : index
    %c0_19 = arith.constant 0 : index
    %21 = vector.load %arg3[%c1_17, %c0_18, %c0_19] : memref<5x1x128xf32, #tpu.memory_space<vmem>>, vector<1x1x128xf32>
    %22 = vector.shape_cast %21 : vector<1x1x128xf32> to vector<1x128xf32>
    %23 = vector.broadcast %22 : vector<1x128xf32> to vector<32x128xf32>
    %24 = arith.addf %20, %23 : vector<32x128xf32>
    %cst_20 = arith.constant 0.000000e+00 : f32
    %25 = vector.broadcast %cst_20 : f32 to vector<32x128xf32>
    %26 = arith.maximumf %24, %25 : vector<32x128xf32>
    %27 = arith.truncf %26 : vector<32x128xf32> to vector<32x128xbf16>
    %c2 = arith.constant 2 : index
    %c0_21 = arith.constant 0 : index
    %c0_22 = arith.constant 0 : index
    %28 = vector.load %arg2[%c2, %c0_21, %c0_22] : memref<5x128x128xbf16, #tpu.memory_space<vmem>>, vector<1x128x128xbf16>
    %29 = vector.shape_cast %28 : vector<1x128x128xbf16> to vector<128x128xbf16>
    %cst_23 = arith.constant dense<0.000000e+00> : vector<32x128xf32>
    %30 = tpu.matmul %27, %29, %cst_23 {dimension_numbers = #tpu.dot_dimension_numbers<[1], [0], [0], [1], [0, 0, 1, 1], [], []>} : vector<32x128xbf16>, vector<128x128xbf16>, vector<32x128xf32> -> vector<32x128xf32>
    %c0_24 = arith.constant 0 : index
    %c0_25 = arith.constant 0 : index
    %31 = vector.load %arg0[%c0_24, %c0_25] : memref<32x32xbf16, #tpu.memory_space<vmem>>, vector<32x32xbf16>
    %32 = arith.truncf %30 : vector<32x128xf32> to vector<32x128xbf16>
    %cst_26 = arith.constant dense<0.000000e+00> : vector<32x128xf32>
    %33 = tpu.matmul %31, %32, %cst_26 {dimension_numbers = #tpu.dot_dimension_numbers<[1], [0], [0], [1], [0, 0, 1, 1], [], []>} : vector<32x32xbf16>, vector<32x128xbf16>, vector<32x128xf32> -> vector<32x128xf32>
    %c2_27 = arith.constant 2 : index
    %c0_28 = arith.constant 0 : index
    %c0_29 = arith.constant 0 : index
    %34 = vector.load %arg3[%c2_27, %c0_28, %c0_29] : memref<5x1x128xf32, #tpu.memory_space<vmem>>, vector<1x1x128xf32>
    %35 = vector.shape_cast %34 : vector<1x1x128xf32> to vector<1x128xf32>
    %36 = vector.broadcast %35 : vector<1x128xf32> to vector<32x128xf32>
    %37 = arith.addf %33, %36 : vector<32x128xf32>
    %cst_30 = arith.constant 0.000000e+00 : f32
    %38 = vector.broadcast %cst_30 : f32 to vector<32x128xf32>
    %39 = arith.maximumf %37, %38 : vector<32x128xf32>
    %40 = arith.truncf %39 : vector<32x128xf32> to vector<32x128xbf16>
    %c3 = arith.constant 3 : index
    %c0_31 = arith.constant 0 : index
    %c0_32 = arith.constant 0 : index
    %41 = vector.load %arg2[%c3, %c0_31, %c0_32] : memref<5x128x128xbf16, #tpu.memory_space<vmem>>, vector<1x128x128xbf16>
    %42 = vector.shape_cast %41 : vector<1x128x128xbf16> to vector<128x128xbf16>
    %cst_33 = arith.constant dense<0.000000e+00> : vector<32x128xf32>
    %43 = tpu.matmul %40, %42, %cst_33 {dimension_numbers = #tpu.dot_dimension_numbers<[1], [0], [0], [1], [0, 0, 1, 1], [], []>} : vector<32x128xbf16>, vector<128x128xbf16>, vector<32x128xf32> -> vector<32x128xf32>
    %c0_34 = arith.constant 0 : index
    %c0_35 = arith.constant 0 : index
    %44 = vector.load %arg0[%c0_34, %c0_35] : memref<32x32xbf16, #tpu.memory_space<vmem>>, vector<32x32xbf16>
    %45 = arith.truncf %43 : vector<32x128xf32> to vector<32x128xbf16>
    %cst_36 = arith.constant dense<0.000000e+00> : vector<32x128xf32>
    %46 = tpu.matmul %44, %45, %cst_36 {dimension_numbers = #tpu.dot_dimension_numbers<[1], [0], [0], [1], [0, 0, 1, 1], [], []>} : vector<32x32xbf16>, vector<32x128xbf16>, vector<32x128xf32> -> vector<32x128xf32>
    %c3_37 = arith.constant 3 : index
    %c0_38 = arith.constant 0 : index
    %c0_39 = arith.constant 0 : index
    %47 = vector.load %arg3[%c3_37, %c0_38, %c0_39] : memref<5x1x128xf32, #tpu.memory_space<vmem>>, vector<1x1x128xf32>
    %48 = vector.shape_cast %47 : vector<1x1x128xf32> to vector<1x128xf32>
    %49 = vector.broadcast %48 : vector<1x128xf32> to vector<32x128xf32>
    %50 = arith.addf %46, %49 : vector<32x128xf32>
    %cst_40 = arith.constant 0.000000e+00 : f32
    %51 = vector.broadcast %cst_40 : f32 to vector<32x128xf32>
    %52 = arith.maximumf %50, %51 : vector<32x128xf32>
    %53 = arith.truncf %52 : vector<32x128xf32> to vector<32x128xbf16>
    %c4 = arith.constant 4 : index
    %c0_41 = arith.constant 0 : index
    %c0_42 = arith.constant 0 : index
    %54 = vector.load %arg2[%c4, %c0_41, %c0_42] : memref<5x128x128xbf16, #tpu.memory_space<vmem>>, vector<1x128x128xbf16>
    %55 = vector.shape_cast %54 : vector<1x128x128xbf16> to vector<128x128xbf16>
    %cst_43 = arith.constant dense<0.000000e+00> : vector<32x128xf32>
    %56 = tpu.matmul %53, %55, %cst_43 {dimension_numbers = #tpu.dot_dimension_numbers<[1], [0], [0], [1], [0, 0, 1, 1], [], []>} : vector<32x128xbf16>, vector<128x128xbf16>, vector<32x128xf32> -> vector<32x128xf32>
    %c0_44 = arith.constant 0 : index
    %c0_45 = arith.constant 0 : index
    %57 = vector.load %arg0[%c0_44, %c0_45] : memref<32x32xbf16, #tpu.memory_space<vmem>>, vector<32x32xbf16>
    %58 = arith.truncf %56 : vector<32x128xf32> to vector<32x128xbf16>
    %cst_46 = arith.constant dense<0.000000e+00> : vector<32x128xf32>
    %59 = tpu.matmul %57, %58, %cst_46 {dimension_numbers = #tpu.dot_dimension_numbers<[1], [0], [0], [1], [0, 0, 1, 1], [], []>} : vector<32x32xbf16>, vector<32x128xbf16>, vector<32x128xf32> -> vector<32x128xf32>
    %c4_47 = arith.constant 4 : index
    %c0_48 = arith.constant 0 : index
    %c0_49 = arith.constant 0 : index
    %60 = vector.load %arg3[%c4_47, %c0_48, %c0_49] : memref<5x1x128xf32, #tpu.memory_space<vmem>>, vector<1x1x128xf32>
    %61 = vector.shape_cast %60 : vector<1x1x128xf32> to vector<1x128xf32>
    %62 = vector.broadcast %61 : vector<1x128xf32> to vector<32x128xf32>
    %63 = arith.addf %59, %62 : vector<32x128xf32>
    %cst_50 = arith.constant 0.000000e+00 : f32
    %64 = vector.broadcast %cst_50 : f32 to vector<32x128xf32>
    %65 = arith.maximumf %63, %64 : vector<32x128xf32>
    %c0_51 = arith.constant 0 : index
    %c0_52 = arith.constant 0 : index
    %66 = vector.load %arg4[%c0_51, %c0_52] : memref<32x128xf32, #tpu.memory_space<vmem>>, vector<32x128xf32>
    tpu.vector_store %arg4[%c0_51, %c0_52], %65 {strides = array<i32>} : memref<32x128xf32, #tpu.memory_space<vmem>>, vector<32x128xf32>,
    return
  }
}

</mosaic_0001>

<bundles_post_ra>
// kernel: gcn_forward_fused.1
= control target key start
LH: loop header
LB: loop body
LE: loop exit
PB: predicated region body
PF: predicated region fallthrough
CT: control target
= control target key end

     0   :  { %9 = vsyncpa [#allocation3], 0  ;;  %s904_s18 = smov [#allocation2]   ;;  %s905_s20 = smov 64   ;;  %s1004_s0 = inlined_call_operand.vmem [shape: bf16[32,32], index: 0, kind: input, shape index: {}]   ;;  %s1005_s1 = inlined_call_operand.vmem [shape: f32[32,128], index: 1, kind: input, shape index: {}]   ;;  %s1006_s2 = inlined_call_operand.hbm [shape: bf16[5,128,128], index: 2, kind: input, shape index: {}]   ;;  %s1007_s3 = inlined_call_operand.vmem [shape: f32[5,1,128], index: 3, kind: input, shape index: {}]   ;;  %s1008_s4 = inlined_call_operand.vmem [shape: f32[32,128], index: 4, kind: output, shape index: {}]  }
   0x1   :  { %s18_s17 = sshll.u32 %s1006_s2, 4  ;;  %s20_s19 = sshll.u32 %s904_s18, 4  ;;  %s19_s17 = int_to_ptr.hbm [resolvable:$true] %s18_s17  ;;  %s21_s19 = int_to_ptr.vmem [resolvable:$true] %s20_s19 }
   0x2   :  { %s906_s21 = smov 4  }
   0x3   :  { %26 = dma.hbm_to_vmem [thread:$0]  %s19_s17, 5120, %s21_s19, [#allocation3], %s905_s20, %s905_s20, %s906_s21  }
   0x4   :  { %902 = dma.done.wait [#allocation3], 5120  }
   0x5   :  { %903 = vsyncadd [#allocation3], 4294962176  ;;  %v835_v0 = vld [vmem:[#allocation2 + $0x38] sm:$0xff]  ;;  %v834_v1 = vld [vmem:[#allocation2 + $0x30] sm:$0xff]  ;;  %vm143_vm0 = vcmask 261120  }
   0x6   :  { %104 = vmatpush.bf16.msra.mxu0 %v835_v0  ;;  %v833_v2 = vld [vmem:[#allocation2 + $0x28] sm:$0xff]  ;;  %v832_v3 = vld [vmem:[#allocation2 + $0x20] sm:$0xff]  ;;  %v831_v4 = vld [vmem:[#allocation2 + $0x18] sm:$0xff] }
   0x7   :  { %v830_v5 = vld [vmem:[#allocation2 + $0x10] sm:$0xff]  ;;  %v829_v6 = vld [vmem:[#allocation2 + $0x8] sm:$0xff]  ;;  %v828_v7 = vld [vmem:[#allocation2] sm:$0xff] }
   0x8   :  { %v34_v8 = vld [vmem:[%s1005_s1] sm:$0xff]  ;;  %v35_v9 = vld [vmem:[%s1005_s1 + $0x8] sm:$0xff]  ;;  %v36_v11 = vld [vmem:[%s1005_s1 + $0x10] sm:$0xff] }
   0x9   :  { %v38_v10 = vpack.c.bf16 %v35_v9, %v34_v8  ;;  %v37_v12 = vld [vmem:[%s1005_s1 + $0x18] sm:$0xff]  ;;  %v844_v18 = vld [vmem:[#allocation2 + $0x70] sm:$0xff]  ;;  %v843_v20 = vld [vmem:[#allocation2 + $0x68] sm:$0xff] }
   0xa   :  { %105 = vmatpush.bf16.msra.mxu0 %v834_v1  ;;  %v39_v13 = vpack.c.bf16 %v37_v12, %v36_v11  ;;  %v845_v17 = vld [vmem:[#allocation2 + $0x78] sm:$0xff]  ;;  %v842_v22 = vld [vmem:[#allocation2 + $0x60] sm:$0xff]  ;;  %v957_v25 = vld [vmem:[%s1004_s0 + $0x8] sm:$0xff] }
   0xb   :  { %240 = vmatpush.bf16.msra.mxu2 %v845_v17  ;;  %v950_v24 = vld [vmem:[%s1004_s0] sm:$0xff]  ;;  %v841_v26 = vld [vmem:[#allocation2 + $0x58] sm:$0xff]  ;;  %v840_v27 = vld [vmem:[#allocation2 + $0x50] sm:$0xff] }
   0xc   :  { %v839_v28 = vld [vmem:[#allocation2 + $0x48] sm:$0xff]  ;;  %v838_v29 = vld [vmem:[#allocation2 + $0x40] sm:$0xff]  ;;  %v853_v48 = vld [vmem:[#allocation2 + $0xb8] sm:$0xff] }
   0xd   :  { %v873_v31 = vld [vmem:[%s1007_s3] ss:$0 sm:$0xff]  ;;  %v852_v49 = vld [vmem:[#allocation2 + $0xb0] sm:$0xff]  ;;  %v851_v51 = vld [vmem:[#allocation2 + $0xa8] sm:$0xff] }
   0xe   :  { %106 = vmatpush.bf16.msra.mxu0 %v833_v2  ;;  %v850_v53 = vld [vmem:[#allocation2 + $0xa0] sm:$0xff]  ;;  %v849_v55 = vld [vmem:[#allocation2 + $0x98] sm:$0xff]  ;;  %v848_v56 = vld [vmem:[#allocation2 + $0x90] sm:$0xff] }
   0xf   :  { %241 = vmatpush.bf16.msra.mxu2 %v844_v18  ;;  %v847_v57 = vld [vmem:[#allocation2 + $0x88] sm:$0xff]  ;;  %v846_v58 = vld [vmem:[#allocation2 + $0x80] sm:$0xff] }
  0x10   :  { %v874_v60 = vld [vmem:[%s1007_s3 + $0x1] ss:$0 sm:$0xff] }
  0x11   :  { %v858_v18 = vld [vmem:[#allocation2 + $0xe0] sm:$0xff] }
  0x12   :  { %107 = vmatpush.bf16.msra.mxu0 %v832_v3 }
  0x13   :  { %242 = vmatpush.bf16.msra.mxu2 %v843_v20  ;;  %v857_v20 = vld [vmem:[#allocation2 + $0xd8] sm:$0xff] }
  0x16   :  { %108 = vmatpush.bf16.msra.mxu0 %v831_v4 }
  0x17   :  { %243 = vmatpush.bf16.msra.mxu2 %v842_v22  ;;  %v855_v22 = vld [vmem:[#allocation2 + $0xc8] sm:$0xff] }
  0x1a   :  { %109 = vmatpush.bf16.msra.mxu0 %v830_v5 }
  0x1b   :  { %244 = vmatpush.bf16.msra.mxu2 %v841_v26 }
  0x1e   :  { %110 = vmatpush.bf16.msra.mxu0 %v829_v6 }
  0x1f   :  { %245 = vmatpush.bf16.msra.mxu2 %v840_v27  ;;  %v875_v27 = vld [vmem:[%s1007_s3 + $0x2] ss:$0 sm:$0xff] }
  0x22   :  { %111 = vmatpush.bf16.msra.mxu0 %v828_v7 }
  0x23   :  { %246 = vmatpush.bf16.msra.mxu2 %v839_v28 }
  0x25   :  { %112 = vmatmul.bf16.vlgmr.msra.gmra.mxu0 %v38_v10 }
  0x27   :  { %247 = vmatpush.bf16.msra.mxu2 %v838_v29 }
  0x35   :  { %117 = vmatmul.bf16.gmra.mxu0 %v39_v13  ;;  %v861_v13 = vld [vmem:[#allocation2 + $0xf8] sm:$0xff] }
  0x36   :  { %472 = vmatpush.bf16.msrb.mxu0 %v861_v13 }
  0xa2   :  { %v113_v14 = vpop.f32.mrf.mxu0 }
  0xaa   :  { %v115_v15 = vpop.f32.mrf.mxu0 }
  0xab   :  { %v127_v23 = vpack.c.bf16 %v115_v15, %v113_v14  ;;  %v860_v14 = vld [vmem:[#allocation2 + $0xf0] sm:$0xff] }
  0xac   :  { %473 = vmatpush.bf16.msrb.mxu0 %v860_v14 }
  0xb2   :  { %v118_v16 = vpop.f32.mrf.mxu0 }
  0xba   :  { %v120_v19 = vpop.f32.mrf.mxu0 }
  0xbb   :  { %v128_v21 = vpack.c.bf16 %v120_v19, %v118_v16  ;;  %v859_v16 = vld [vmem:[#allocation2 + $0xe8] sm:$0xff] }
  0xbc   :  { %474 = vmatpush.bf16.msrb.mxu0 %v859_v16 }
  0xbd   :  { %156 = vmatpush.bf16.msra.mxu1 %v128_v21  ;;  %v856_v21 = vld [vmem:[#allocation2 + $0xd0] sm:$0xff] }
  0xc0   :  { %475 = vmatpush.bf16.msrb.mxu0 %v858_v18 }
  0xc1   :  { %157 = vmatpush.bf16.msra.mxu1 %v127_v23  ;;  %v854_v23 = vld [vmem:[#allocation2 + $0xc0] sm:$0xff] }
  0xc4   :  { %686 = vmatmul.msk.bf16.vlgmr.msra.gmra.mxu1 %vm143_vm0, %v950_v24  ;;  %476 = vmatpush.bf16.msrb.mxu0 %v857_v20 }
  0xc5   :  { %356 = vmatpush.bf16.msrb.mxu1 %v853_v48 }
  0xc8   :  { %477 = vmatpush.bf16.msrb.mxu0 %v856_v21 }
  0xc9   :  { %357 = vmatpush.bf16.msrb.mxu1 %v852_v49  ;;  %v866_v49 = vld [vmem:[#allocation2 + $0x120] sm:$0xff] }
  0xcc   :  { %478 = vmatpush.bf16.msrb.mxu0 %v855_v22 }
  0xcd   :  { %358 = vmatpush.bf16.msrb.mxu1 %v851_v51  ;;  %v865_v51 = vld [vmem:[#allocation2 + $0x118] sm:$0xff] }
  0xd0   :  { %479 = vmatpush.bf16.msrb.mxu0 %v854_v23 }
  0xd1   :  { %359 = vmatpush.bf16.msrb.mxu1 %v850_v53  ;;  %v863_v53 = vld [vmem:[#allocation2 + $0x108] sm:$0xff] }
  0xd4   :  { %687 = vmatmul.msk.bf16.gmra.mxu1 %vm143_vm0, %v957_v25 }
  0xd5   :  { %360 = vmatpush.bf16.msrb.mxu1 %v849_v55 }
  0xd9   :  { %361 = vmatpush.bf16.msrb.mxu1 %v848_v56  ;;  %v876_v56 = vld [vmem:[%s1007_s3 + $0x3] ss:$0 sm:$0xff] }
  0xdd   :  { %362 = vmatpush.bf16.msrb.mxu1 %v847_v57 }
  0xe1   :  { %363 = vmatpush.bf16.msrb.mxu1 %v846_v58 }
 0x141   :  { %v159_v30 = vpop.f32.mrf.mxu1 }
 0x142   :  { %v160_v32 = vadd.f32 %v873_v31, %v159_v30 }
 0x144   :  { %v169_v35 = vmax.f32 %v160_v32, 0.0 }
 0x149   :  { %v161_v33 = vpop.f32.mrf.mxu1 }
 0x14a   :  { %v162_v34 = vadd.f32 %v873_v31, %v161_v33 }
 0x14c   :  { %v170_v36 = vmax.f32 %v162_v34, 0.0 }
 0x14e   :  { %v173_v37 = vpack.c.bf16 %v170_v36, %v169_v35 }
 0x150   :  { %248 = vmatmul.bf16.vlgmr.msra.gmra.mxu2 %v173_v37 }
 0x151   :  { %v164_v38 = vpop.f32.mrf.mxu1 }
 0x152   :  { %v165_v39 = vadd.f32 %v873_v31, %v164_v38 }
 0x154   :  { %v171_v42 = vmax.f32 %v165_v39, 0.0 }
 0x159   :  { %v166_v40 = vpop.f32.mrf.mxu1 }
 0x15a   :  { %v167_v41 = vadd.f32 %v873_v31, %v166_v40 }
 0x15c   :  { %v172_v43 = vmax.f32 %v167_v41, 0.0 }
 0x15e   :  { %v174_v44 = vpack.c.bf16 %v172_v43, %v171_v42 }
 0x160   :  { %253 = vmatmul.bf16.gmra.mxu2 %v174_v44  ;;  %v869_v44 = vld [vmem:[#allocation2 + $0x138] sm:$0xff] }
 0x161   :  { %588 = vmatpush.bf16.msra.mxu1 %v869_v44 }
 0x1d3   :  { %v249_v45 = vpop.f32.mrf.mxu2 }
 0x1db   :  { %v251_v46 = vpop.f32.mrf.mxu2 }
 0x1dc   :  { %v259_v54 = vpack.c.bf16 %v251_v46, %v249_v45  ;;  %v868_v45 = vld [vmem:[#allocation2 + $0x130] sm:$0xff] }
 0x1dd   :  { %589 = vmatpush.bf16.msra.mxu1 %v868_v45 }
 0x1e3   :  { %v254_v47 = vpop.f32.mrf.mxu2 }
 0x1eb   :  { %v256_v50 = vpop.f32.mrf.mxu2 }
 0x1ec   :  { %v260_v52 = vpack.c.bf16 %v256_v50, %v254_v47  ;;  %v867_v47 = vld [vmem:[#allocation2 + $0x128] sm:$0xff] }
 0x1ed   :  { %590 = vmatpush.bf16.msra.mxu1 %v867_v47 }
 0x1ee   :  { %272 = vmatpush.bf16.msra.mxu3 %v260_v52  ;;  %v864_v52 = vld [vmem:[#allocation2 + $0x110] sm:$0xff] }
 0x1f1   :  { %591 = vmatpush.bf16.msra.mxu1 %v866_v49 }
 0x1f2   :  { %273 = vmatpush.bf16.msra.mxu3 %v259_v54  ;;  %v862_v54 = vld [vmem:[#allocation2 + $0x100] sm:$0xff] }
 0x1f5   :  { %721 = vmatmul.msk.bf16.vlgmr.msra.gmra.mxu3 %vm143_vm0, %v950_v24  ;;  %592 = vmatpush.bf16.msra.mxu1 %v865_v51 }
 0x1f9   :  { %593 = vmatpush.bf16.msra.mxu1 %v864_v52 }
 0x1fd   :  { %594 = vmatpush.bf16.msra.mxu1 %v863_v53 }
 0x201   :  { %595 = vmatpush.bf16.msra.mxu1 %v862_v54 }
 0x205   :  { %722 = vmatmul.msk.bf16.gmra.mxu3 %vm143_vm0, %v957_v25 }
 0x278   :  { %v275_v59 = vpop.f32.mrf.mxu3 }
 0x279   :  { %v276_v61 = vadd.f32 %v874_v60, %v275_v59 }
 0x27b   :  { %v285_v0 = vmax.f32 %v276_v61, 0.0 }
 0x280   :  { %v277_v62 = vpop.f32.mrf.mxu3 }
 0x281   :  { %v278_v63 = vadd.f32 %v874_v60, %v277_v62 }
 0x283   :  { %v286_v1 = vmax.f32 %v278_v63, 0.0 }
 0x285   :  { %v289_v2 = vpack.c.bf16 %v286_v1, %v285_v0 }
 0x287   :  { %364 = vmatmul.bf16.vlgmr.msrb.gmra.mxu1 %v289_v2 }
 0x288   :  { %v280_v3 = vpop.f32.mrf.mxu3 }
 0x289   :  { %v281_v4 = vadd.f32 %v874_v60, %v280_v3 }
 0x28b   :  { %v287_v7 = vmax.f32 %v281_v4, 0.0 }
 0x290   :  { %v282_v5 = vpop.f32.mrf.mxu3 }
 0x291   :  { %v283_v6 = vadd.f32 %v874_v60, %v282_v5 }
 0x293   :  { %v288_v8 = vmax.f32 %v283_v6, 0.0 }
 0x295   :  { %v290_v9 = vpack.c.bf16 %v288_v8, %v287_v7 }
 0x297   :  { %369 = vmatmul.bf16.gmra.mxu1 %v290_v9 }
 0x304   :  { %v365_v10 = vpop.f32.mrf.mxu1 }
 0x30c   :  { %v367_v11 = vpop.f32.mrf.mxu1 }
 0x30d   :  { %v375_v19 = vpack.c.bf16 %v367_v11, %v365_v10 }
 0x314   :  { %v370_v12 = vpop.f32.mrf.mxu1 }
 0x31c   :  { %v372_v15 = vpop.f32.mrf.mxu1 }
 0x31d   :  { %v376_v17 = vpack.c.bf16 %v372_v15, %v370_v12  ;;  %v877_v12 = vld [vmem:[%s1007_s3 + $0x4] ss:$0 sm:$0xff] }
 0x31f   :  { %388 = vmatpush.bf16.msrb.mxu3 %v376_v17 }
 0x323   :  { %389 = vmatpush.bf16.msrb.mxu3 %v375_v19 }
 0x326   :  { %756 = vmatmul.msk.bf16.vlgmr.msrb.gmra.mxu3 %vm143_vm0, %v950_v24 }
 0x336   :  { %757 = vmatmul.msk.bf16.gmra.mxu3 %vm143_vm0, %v957_v25 }
 0x3a9   :  { %v391_v26 = vpop.f32.mrf.mxu3 }
 0x3aa   :  { %v392_v28 = vadd.f32 %v875_v27, %v391_v26 }
 0x3ac   :  { %v401_v31 = vmax.f32 %v392_v28, 0.0 }
 0x3b1   :  { %v393_v29 = vpop.f32.mrf.mxu3 }
 0x3b2   :  { %v394_v30 = vadd.f32 %v875_v27, %v393_v29 }
 0x3b4   :  { %v402_v32 = vmax.f32 %v394_v30, 0.0 }
 0x3b6   :  { %v405_v33 = vpack.c.bf16 %v402_v32, %v401_v31 }
 0x3b8   :  { %480 = vmatmul.bf16.vlgmr.msrb.gmra.mxu0 %v405_v33 }
 0x3b9   :  { %v396_v34 = vpop.f32.mrf.mxu3 }
 0x3ba   :  { %v397_v35 = vadd.f32 %v875_v27, %v396_v34 }
 0x3bc   :  { %v403_v38 = vmax.f32 %v397_v35, 0.0 }
 0x3c1   :  { %v398_v36 = vpop.f32.mrf.mxu3 }
 0x3c2   :  { %v399_v37 = vadd.f32 %v875_v27, %v398_v36 }
 0x3c4   :  { %v404_v39 = vmax.f32 %v399_v37, 0.0 }
 0x3c6   :  { %v406_v40 = vpack.c.bf16 %v404_v39, %v403_v38 }
 0x3c8   :  { %485 = vmatmul.bf16.gmra.mxu0 %v406_v40 }
 0x435   :  { %v481_v41 = vpop.f32.mrf.mxu0 }
 0x43d   :  { %v483_v42 = vpop.f32.mrf.mxu0 }
 0x43e   :  { %v491_v50 = vpack.c.bf16 %v483_v42, %v481_v41 }
 0x445   :  { %v486_v43 = vpop.f32.mrf.mxu0 }
 0x44d   :  { %v488_v46 = vpop.f32.mrf.mxu0 }
 0x44e   :  { %v492_v48 = vpack.c.bf16 %v488_v46, %v486_v43 }
 0x450   :  { %504 = vmatpush.bf16.msrb.mxu2 %v492_v48 }
 0x454   :  { %505 = vmatpush.bf16.msrb.mxu2 %v491_v50 }
 0x457   :  { %791 = vmatmul.msk.bf16.vlgmr.msrb.gmra.mxu2 %vm143_vm0, %v950_v24 }
 0x467   :  { %792 = vmatmul.msk.bf16.gmra.mxu2 %vm143_vm0, %v957_v25 }
 0x4da   :  { %v507_v55 = vpop.f32.mrf.mxu2 }
 0x4db   :  { %v508_v57 = vadd.f32 %v876_v56, %v507_v55 }
 0x4dd   :  { %v517_v60 = vmax.f32 %v508_v57, 0.0 }
 0x4e2   :  { %v509_v58 = vpop.f32.mrf.mxu2 }
 0x4e3   :  { %v510_v59 = vadd.f32 %v876_v56, %v509_v58 }
 0x4e5   :  { %v518_v61 = vmax.f32 %v510_v59, 0.0 }
 0x4e7   :  { %v521_v62 = vpack.c.bf16 %v518_v61, %v517_v60 }
 0x4e9   :  { %596 = vmatmul.bf16.vlgmr.msra.gmra.mxu1 %v521_v62 }
 0x4ea   :  { %v512_v63 = vpop.f32.mrf.mxu2 }
 0x4eb   :  { %v513_v0 = vadd.f32 %v876_v56, %v512_v63 }
 0x4ed   :  { %v519_v3 = vmax.f32 %v513_v0, 0.0 }
 0x4f2   :  { %v514_v1 = vpop.f32.mrf.mxu2 }
 0x4f3   :  { %v515_v2 = vadd.f32 %v876_v56, %v514_v1 }
 0x4f5   :  { %v520_v4 = vmax.f32 %v515_v2, 0.0 }
 0x4f7   :  { %v522_v5 = vpack.c.bf16 %v520_v4, %v519_v3 }
 0x4f9   :  { %601 = vmatmul.bf16.gmra.mxu1 %v522_v5 }
 0x566   :  { %v597_v6 = vpop.f32.mrf.mxu1 }
 0x56e   :  { %v599_v7 = vpop.f32.mrf.mxu1 }
 0x56f   :  { %v607_v11 = vpack.c.bf16 %v599_v7, %v597_v6 }
 0x576   :  { %v602_v8 = vpop.f32.mrf.mxu1 }
 0x57e   :  { %v604_v9 = vpop.f32.mrf.mxu1 }
 0x57f   :  { %v608_v10 = vpack.c.bf16 %v604_v9, %v602_v8 }
 0x581   :  { %620 = vmatpush.bf16.msra.mxu3 %v608_v10 }
 0x585   :  { %621 = vmatpush.bf16.msra.mxu3 %v607_v11 }
 0x588   :  { %826 = vmatmul.msk.bf16.vlgmr.msra.gmra.mxu3 %vm143_vm0, %v950_v24 }
 0x598   :  { %827 = vmatmul.msk.bf16.gmra.mxu3 %vm143_vm0, %v957_v25 }
 0x60b   :  { %v623_v13 = vpop.f32.mrf.mxu3 }
 0x60c   :  { %v624_v14 = vadd.f32 %v877_v12, %v623_v13 }
 0x60e   :  { %v633_v15 = vmax.f32 %v624_v14, 0.0 }
 0x610   :  { %637 = vst [vmem:[%s1008_s4] sm:$0xff] %v633_v15 }
 0x613   :  { %v625_v16 = vpop.f32.mrf.mxu3 }
 0x614   :  { %v626_v17 = vadd.f32 %v877_v12, %v625_v16 }
 0x616   :  { %v634_v18 = vmax.f32 %v626_v17, 0.0 }
 0x618   :  { %638 = vst [vmem:[%s1008_s4 + $0x8] sm:$0xff] %v634_v18 }
 0x61b   :  { %v628_v24 = vpop.f32.mrf.mxu3 }
 0x61c   :  { %v629_v25 = vadd.f32 %v877_v12, %v628_v24 }
 0x61e   :  { %v635_v19 = vmax.f32 %v629_v25, 0.0 }
 0x620   :  { %639 = vst [vmem:[%s1008_s4 + $0x10] sm:$0xff] %v635_v19 }
 0x623   :  { %v630_v20 = vpop.f32.mrf.mxu3 }
 0x624   :  { %v631_v21 = vadd.f32 %v877_v12, %v630_v20 }
 0x626   :  { %v636_v22 = vmax.f32 %v631_v21, 0.0 }
 0x628   :  { %640 = vst [vmem:[%s1008_s4 + $0x18] sm:$0xff] %v636_v22 }
 0x629   :  { %645 = vsyncpa [#allocation3], 1 }

</bundles_post_ra>
